<compile_context>
chip_gen: v7x
topology: tpu7x:2x2x1
jax: 0.10.0
libtpu: 0.0.40
codegen_flags: <defaults>
</compile_context>

<pallas_src>
import functools

import jax
import jax.numpy as jnp
import numpy as np
from jax import lax
from jax.experimental import pallas as pl
from jax.experimental.pallas import tpu as pltpu


# ----------------------------- glue (plain JAX) -----------------------------

def _apply_padding(x, k, padding, dilation):
    if padding == -1:  # torch padding='same' (requires stride == 1, like torch)
        tot = dilation * (k - 1)
        lo = tot // 2
        return jnp.pad(x, ((0, 0), (0, 0), (lo, tot - lo), (lo, tot - lo)))
    elif isinstance(padding, int) and padding > 0:
        return jnp.pad(x, ((0, 0), (0, 0), (padding, padding), (padding, padding)))
    return x


def _im2col(x, k, stride, dilation):
    """x: (B, C, H, W) already padded -> patches (B, C*k*k, Ho*Wo), Ho, Wo.

    Flat row index = c*k*k + (i*k + j)  (matches the depthwise-weight layout).
    """
    B, C, H, W = x.shape
    Ho = (H - dilation * (k - 1) - 1) // stride + 1
    Wo = (W - dilation * (k - 1) - 1) // stride + 1
    cols = []
    for i in range(k):
        for j in range(k):
            sl = x[:, :,
                   i * dilation: i * dilation + (Ho - 1) * stride + 1: stride,
                   j * dilation: j * dilation + (Wo - 1) * stride + 1: stride]
            cols.append(sl.reshape(B, C, 1, Ho * Wo))
    patches = jnp.concatenate(cols, axis=2).reshape(B, C * k * k, Ho * Wo)
    return patches, Ho, Wo


def _choose_tn(np_pad128, target):
    """Largest multiple of 128 that divides np_pad128 and is <= target."""
    best = 128
    tn = 128
    limit = min(target, np_pad128)
    while tn <= limit:
        if np_pad128 % tn == 0:
            best = tn
        tn += 128
    return best


# ------------------------------ Pallas kernel -------------------------------

def _conv_plus_kernel(pmean_ref, patches_ref, w1t_ref, wint_ref, winb_ref,
                      woutw_ref, woutb_ref, bw_ref, bb_ref, o_ref, *, scale):
    hi = jax.lax.Precision.HIGHEST

    # Per-batch patch means (full-Np reduction done in the wrapper), (1, CK).
    pmean_row = pmean_ref[0]

    # (1) ConvMaker.kernel: depthwise conv + spatial Mean == contraction of the
    # (block-diagonal, pre-expanded) depthwise weight with the patch means.
    kgen_row = jnp.dot(pmean_row, w1t_ref[...],
                       preferred_element_type=jnp.float32, precision=hi)   # (1, CK)

    # (2) weight_in: 1x1 conv over channels, Kronecker-expanded to flat CK form.
    w_in_row = jnp.dot(kgen_row, wint_ref[...],
                       preferred_element_type=jnp.float32,
                       precision=hi) + winb_ref[...]                        # (1, CK)

    # (3) weight_out: kxk conv on a kxk map == contraction over CK.
    w_out_col = (jnp.sum(woutw_ref[...] * kgen_row, axis=-1, keepdims=True)
                 + woutb_ref[...])                                          # (Cout, 1)

    # (5) bias_out: same structure as weight_out.
    b_col = (jnp.sum(bw_ref[...] * kgen_row, axis=-1, keepdims=True)
             + bb_ref[...])                                                 # (Cout, 1)

    # (4) generated per-sample conv weight, built for ALL channels at once.
    z = w_in_row * w_out_col                                                # (Cout, CK)
    sig = 1.0 / (1.0 + jnp.exp(-z))
    wgen = (sig * 2.0 - 1.0) * (2.0 * scale)                                # (Cout, CK)

    # (6) main conv: ONE fused bf16 MXU matmul on this Np tile.
    patches = patches_ref[0]                                                # (CK, TN) bf16
    y = jnp.dot(wgen.astype(patches.dtype), patches,
                preferred_element_type=jnp.float32)                         # (Cout, TN) f32
    o_ref[0] = (y + b_col).astype(o_ref.dtype)


# -------------------------------- wrapper ------------------------------------

def base_conv_plus(x, params, *, kernel_size, stride=1, padding=0,
                   dilation=1, groups=1, tn_target=1024):
    assert groups == 1  # TODO(synk): grouped weight_in/weight_out/main-conv plumbing not implemented.
    k = kernel_size
    kk = k * k
    B, Cin, H, W = x.shape
    CK = Cin * kk

    xp = _apply_padding(x, k, padding, dilation)
    patches, Ho, Wo = _im2col(xp, k, stride, dilation)          # (B, CK, Np) f32
    Np = Ho * Wo

    # Spatial mean is a full-Np reduction -> hoisted here (Np is tiled below).
    pmean = jnp.mean(patches, axis=-1)[:, None, :]              # (B, 1, CK) f32

    # Lane-dense padding of Np + Np-tile size (multiple of 128, <= tn_target).
    # TODO(synk): on v5e, building the kk shifted rows inside the kernel (instead
    # of a materialized im2col slab) would remove the remaining kk x HBM blowup.
    LANE = 128
    np_pad128 = ((Np + LANE - 1) // LANE) * LANE
    TN = _choose_tn(np_pad128, tn_target)
    Np_pad = np_pad128
    assert Np_pad % TN == 0
    NT = Np_pad // TN
    if Np_pad != Np:
        patches = jnp.pad(patches, ((0, 0), (0, 0), (0, Np_pad - Np)))
    patches_bf16 = patches.astype(jnp.bfloat16)                 # hot-path in bf16

    # --- pre-flatten the small parameters to lane-friendly 2D shapes ---------
    w1 = params["w1"]                                           # (Cin, kk, kk)
    Cout = params["wout_w"].shape[0]
    scale = 1.0 / (kk * Cin) ** 0.5

    # Block-diagonal expansion of the depthwise weight: (CK, CK),
    # element [c*kk+t, c*kk+j] = w1[c, t, j]; transposed for row-form matmul.
    w1_bd = (jnp.eye(Cin, dtype=w1.dtype)[:, None, :, None]
             * w1[:, :, None, :]).reshape(CK, CK)
    w1t = w1_bd.T                                               # (CK, CK)

    # weight_in 1x1 conv expanded over the flat CK axis: kron(win_w, I_kk).
    win_exp = jnp.kron(params["win_w"], jnp.eye(kk, dtype=w1.dtype))  # (CK, CK)
    wint = win_exp.T
    winb_row = jnp.repeat(params["win_b"], kk, axis=0).reshape(1, CK)

    woutw2 = params["wout_w"].reshape(Cout, CK)
    woutb = params["wout_b"].reshape(Cout, 1)
    bw2 = params["b_w"].reshape(Cout, CK)
    bb = params["b_b"].reshape(Cout, 1)

    # --- VMEM budget (blocks are small by construction; keep v7x-safe cap) ---
    block_bytes = (2 * CK * TN * 2            # double-buffered bf16 patches tile
                   + 2 * Cout * TN * 4        # double-buffered f32 output tile
                   + 2 * CK * 4)              # pmean block
    weight_bytes = 4 * (2 * CK * CK + CK + 2 * Cout * CK + 2 * Cout)
    vmem_limit = int(min(max(4 * block_bytes + 4 * weight_bytes + (2 << 20),
                             32 * 1024 * 1024),
                         48 * 1024 * 1024))

    kernel = functools.partial(_conv_plus_kernel, scale=scale)

    y = pl.pallas_call(
        kernel,
        out_shape=jax.ShapeDtypeStruct((B, Cout, Np_pad), jnp.float32),
        grid_spec=pltpu.PrefetchScalarGridSpec(
            num_scalar_prefetch=0,
            grid=(B, NT),
            in_specs=[
                pl.BlockSpec((1, 1, CK), lambda b, n: (b, 0, 0)),     # pmean
                pl.BlockSpec((1, CK, TN), lambda b, n: (b, 0, n)),    # patches (bf16)
                pl.BlockSpec((CK, CK), lambda b, n: (0, 0)),          # depthwise (block-diag)^T
                pl.BlockSpec((CK, CK), lambda b, n: (0, 0)),          # weight_in (kron)^T
                pl.BlockSpec((1, CK), lambda b, n: (0, 0)),           # weight_in bias row
                pl.BlockSpec((Cout, CK), lambda b, n: (0, 0)),        # weight_out w
                pl.BlockSpec((Cout, 1), lambda b, n: (0, 0)),         # weight_out b
                pl.BlockSpec((Cout, CK), lambda b, n: (0, 0)),        # bias_out w
                pl.BlockSpec((Cout, 1), lambda b, n: (0, 0)),         # bias_out b
            ],
            out_specs=pl.BlockSpec((1, Cout, TN), lambda b, n: (b, 0, n)),
        ),
        compiler_params=pltpu.CompilerParams(
            dimension_semantics=("parallel", "parallel"),
            vmem_limit_bytes=vmem_limit),
    )(pmean, patches_bf16, w1t, wint, winb_row, woutw2, woutb, bw2, bb)

    return y[:, :, :Np].reshape(B, Cout, Ho, Wo)


# ------------------------- pure-JAX reference (check) ------------------------

def ref_base_conv_plus(x, params, *, kernel_size, stride=1, padding=0, dilation=1):
    k = kernel_size
    kk = k * k
    B, Cin, H, W = x.shape
    Cout = params["wout_w"].shape[0]
    scale = 1.0 / (kk * Cin) ** 0.5
    hi = jax.lax.Precision.HIGHEST

    xp = _apply_padding(x, k, padding, dilation)

    w1_full = params["w1"].reshape(Cin * kk, 1, k, k)
    z = lax.conv_general_dilated(xp, w1_full, (stride, stride), "VALID",
                                 rhs_dilation=(dilation, dilation),
                                 dimension_numbers=("NCHW", "OIHW", "NCHW"),
                                 feature_group_count=Cin, precision=hi)
    kg = z.mean(axis=(2, 3)).reshape(B, Cin, k, k)

    w_in = (jnp.einsum("oc,bcij->boij", params["win_w"], kg, precision=hi)
            + params["win_b"].reshape(1, -1, 1, 1))
    woutw4 = params["wout_w"].reshape(Cout, Cin, k, k)
    w_out = (jnp.einsum("ocij,bcij->bo", woutw4, kg, precision=hi)
             + params["wout_b"].reshape(1, -1))
    weight = (jax.nn.sigmoid(w_in[:, None] * w_out[:, :, None, None, None]) * 2 - 1) * scale * 2

    bw4 = params["b_w"].reshape(Cout, Cin, k, k)
    bias = (jnp.einsum("ocij,bcij->bo", bw4, kg, precision=hi)
            + params["b_b"].reshape(1, -1))

    ys = []
    for b in range(B):
        yb = lax.conv_general_dilated(xp[b:b + 1], weight[b], (stride, stride), "VALID",
                                      rhs_dilation=(dilation, dilation),
                                      dimension_numbers=("NCHW", "OIHW", "NCHW"),
                                      precision=hi)
        ys.append(yb + bias[b].reshape(1, -1, 1, 1))
    return jnp.concatenate(ys, axis=0)


# ---------------------------------- main -------------------------------------

if __name__ == "__main__":
    B, Cin, Cout, H, W, k = 2, 4, 8, 16, 16, 3
    kk = k * k

    key = jax.random.PRNGKey(0)
    ks = jax.random.split(key, 8)
    x = jax.random.normal(ks[0], (B, Cin, H, W), jnp.float32)

    # Deterministic synthetic parameters (shapes implied by ConvMaker.__init__,
    # dims=2, groups=1, bias=True):
    params = {
        "w1":     0.3 * jax.random.normal(ks[1], (Cin, kk, kk), jnp.float32),   # depthwise Conv2d(Cin, Cin*kk, k, groups=Cin)
        "win_w":  0.3 * jax.random.normal(ks[2], (Cin, Cin), jnp.float32),      # weight_in: Conv2d(Cin, Cin, 1)
        "win_b":  0.1 * jax.random.normal(ks[3], (Cin, 1), jnp.float32),
        "wout_w": 0.3 * jax.random.normal(ks[4], (Cout, Cin, kk), jnp.float32), # weight_out: Conv2d(Cin, Cout, k)
        "wout_b": 0.1 * jax.random.normal(ks[5], (Cout, 1), jnp.float32),
        "b_w":    0.3 * jax.random.normal(ks[6], (Cout, Cin, kk), jnp.float32), # bias_out:  Conv2d(Cin, Cout, k)
        "b_b":    0.1 * jax.random.normal(ks[7], (Cout, 1), jnp.float32),
    }

    y = base_conv_plus(x, params, kernel_size=k, stride=1, padding=0,
                       dilation=1, groups=1)
    y = jax.block_until_ready(y)
    assert y.shape == (B, Cout, H - k + 1, W - k + 1), y.shape

    y_ref = ref_base_conv_plus(x, params, kernel_size=k)
    # Hot-path matmul now runs in bf16 (f32 accumulation) -> slightly looser tol.
    np.testing.assert_allclose(np.asarray(y), np.asarray(y_ref),
                               rtol=2e-2, atol=2e-2)
    print("KERNEL_OK")
</pallas_src>

<mosaic_0001>
module attributes {stable_mosaic.version = 11 : i64} {
  func.func @_conv_plus_kernel(%arg0: i32, %arg1: i32, %arg2: memref<1x1x36xf32, #tpu.memory_space<vmem>>, %arg3: memref<1x36x256xbf16, #tpu.memory_space<vmem>>, %arg4: memref<36x36xf32, #tpu.memory_space<vmem>>, %arg5: memref<36x36xf32, #tpu.memory_space<vmem>>, %arg6: memref<1x36xf32, #tpu.memory_space<vmem>>, %arg7: memref<8x36xf32, #tpu.memory_space<vmem>>, %arg8: memref<8x1xf32, #tpu.memory_space<vmem>>, %arg9: memref<8x36xf32, #tpu.memory_space<vmem>>, %arg10: memref<8x1xf32, #tpu.memory_space<vmem>>, %arg11: memref<1x8x256xf32, #tpu.memory_space<vmem>>) attributes {dimension_semantics = [#tpu.dimension_semantics<parallel>, #tpu.dimension_semantics<parallel>], iteration_bounds = array<i64: 2, 1>, scalar_prefetch = 0 : i64, scratch_operands = 0 : i64, tpu.core_type = #tpu.core_type<tc>, window_params = [{transform_indices = @transform_0, window_bounds = array<i64: 1, 1, 36>}, {transform_indices = @transform_1, window_bounds = array<i64: 1, 36, 256>}, {pipeline_mode = #tpu.pipeline_mode<synchronous>, transform_indices = @transform_2, window_bounds = array<i64: 36, 36>}, {pipeline_mode = #tpu.pipeline_mode<synchronous>, transform_indices = @transform_3, window_bounds = array<i64: 36, 36>}, {pipeline_mode = #tpu.pipeline_mode<synchronous>, transform_indices = @transform_4, window_bounds = array<i64: 1, 36>}, {pipeline_mode = #tpu.pipeline_mode<synchronous>, transform_indices = @transform_5, window_bounds = array<i64: 8, 36>}, {pipeline_mode = #tpu.pipeline_mode<synchronous>, transform_indices = @transform_6, window_bounds = array<i64: 8, 1>}, {pipeline_mode = #tpu.pipeline_mode<synchronous>, transform_indices = @transform_7, window_bounds = array<i64: 8, 36>}, {pipeline_mode = #tpu.pipeline_mode<synchronous>, transform_indices = @transform_8, window_bounds = array<i64: 8, 1>}, {transform_indices = @transform_9, window_bounds = array<i64: 1, 8, 256>}]} {
    %c0 = arith.constant 0 : index
    %c0_0 = arith.constant 0 : index
    %c0_1 = arith.constant 0 : index
    %0 = vector.load %arg2[%c0, %c0_0, %c0_1] : memref<1x1x36xf32, #tpu.memory_space<vmem>>, vector<1x1x36xf32>
    %1 = vector.shape_cast %0 : vector<1x1x36xf32> to vector<1x36xf32>
    %c0_2 = arith.constant 0 : index
    %c0_3 = arith.constant 0 : index
    %2 = vector.load %arg4[%c0_2, %c0_3] : memref<36x36xf32, #tpu.memory_space<vmem>>, vector<36x36xf32>
    %cst = arith.constant dense<0.000000e+00> : vector<1x36xf32>
    %3 = tpu.matmul %1, %2, %cst {dimension_numbers = #tpu.dot_dimension_numbers<[1], [0], [0], [1], [0, 0, 1, 1], [], []>, precision = #tpu.contract_precision<fp32>} : vector<1x36xf32>, vector<36x36xf32>, vector<1x36xf32> -> vector<1x36xf32>
    %c0_4 = arith.constant 0 : index
    %c0_5 = arith.constant 0 : index
    %4 = vector.load %arg5[%c0_4, %c0_5] : memref<36x36xf32, #tpu.memory_space<vmem>>, vector<36x36xf32>
    %cst_6 = arith.constant dense<0.000000e+00> : vector<1x36xf32>
    %5 = tpu.matmul %3, %4, %cst_6 {dimension_numbers = #tpu.dot_dimension_numbers<[1], [0], [0], [1], [0, 0, 1, 1], [], []>, precision = #tpu.contract_precision<fp32>} : vector<1x36xf32>, vector<36x36xf32>, vector<1x36xf32> -> vector<1x36xf32>
    %c0_7 = arith.constant 0 : index
    %c0_8 = arith.constant 0 : index
    %6 = vector.load %arg6[%c0_7, %c0_8] : memref<1x36xf32, #tpu.memory_space<vmem>>, vector<1x36xf32>
    %7 = arith.addf %5, %6 : vector<1x36xf32>
    %c0_9 = arith.constant 0 : index
    %c0_10 = arith.constant 0 : index
    %8 = vector.load %arg7[%c0_9, %c0_10] : memref<8x36xf32, #tpu.memory_space<vmem>>, vector<8x36xf32>
    %9 = vector.broadcast %3 : vector<1x36xf32> to vector<8x36xf32>
    %10 = arith.mulf %8, %9 : vector<8x36xf32>
    %cst_11 = arith.constant dense<0.000000e+00> : vector<8xf32>
    %11 = vector.multi_reduction <add>, %10, %cst_11 [1] : vector<8x36xf32> to vector<8xf32>
    %12 = vector.shape_cast %11 : vector<8xf32> to vector<8x1xf32>
    %c0_12 = arith.constant 0 : index
    %c0_13 = arith.constant 0 : index
    %13 = vector.load %arg8[%c0_12, %c0_13] : memref<8x1xf32, #tpu.memory_space<vmem>>, vector<8x1xf32>
    %14 = arith.addf %12, %13 : vector<8x1xf32>
    %c0_14 = arith.constant 0 : index
    %c0_15 = arith.constant 0 : index
    %15 = vector.load %arg9[%c0_14, %c0_15] : memref<8x36xf32, #tpu.memory_space<vmem>>, vector<8x36xf32>
    %16 = vector.broadcast %3 : vector<1x36xf32> to vector<8x36xf32>
    %17 = arith.mulf %15, %16 : vector<8x36xf32>
    %cst_16 = arith.constant dense<0.000000e+00> : vector<8xf32>
    %18 = vector.multi_reduction <add>, %17, %cst_16 [1] : vector<8x36xf32> to vector<8xf32>
    %19 = vector.shape_cast %18 : vector<8xf32> to vector<8x1xf32>
    %c0_17 = arith.constant 0 : index
    %c0_18 = arith.constant 0 : index
    %20 = vector.load %arg10[%c0_17, %c0_18] : memref<8x1xf32, #tpu.memory_space<vmem>>, vector<8x1xf32>
    %21 = arith.addf %19, %20 : vector<8x1xf32>
    %22 = vector.broadcast %7 : vector<1x36xf32> to vector<8x36xf32>
    %23 = vector.broadcast %14 : vector<8x1xf32> to vector<8x36xf32>
    %24 = arith.mulf %22, %23 : vector<8x36xf32>
    %cst_19 = arith.constant 0.000000e+00 : f32
    %25 = vector.broadcast %cst_19 : f32 to vector<8x36xf32>
    %26 = arith.subf %25, %24 : vector<8x36xf32>
    %27 = math.exp %26 : vector<8x36xf32>
    %cst_20 = arith.constant 1.000000e+00 : f32
    %28 = vector.broadcast %cst_20 : f32 to vector<8x36xf32>
    %29 = arith.addf %28, %27 : vector<8x36xf32>
    %cst_21 = arith.constant 1.000000e+00 : f32
    %30 = vector.broadcast %cst_21 : f32 to vector<8x36xf32>
    %31 = arith.divf %30, %29 : vector<8x36xf32>
    %cst_22 = arith.constant 2.000000e+00 : f32
    %32 = vector.broadcast %cst_22 : f32 to vector<8x36xf32>
    %33 = arith.mulf %31, %32 : vector<8x36xf32>
    %cst_23 = arith.constant 1.000000e+00 : f32
    %34 = vector.broadcast %cst_23 : f32 to vector<8x36xf32>
    %35 = arith.subf %33, %34 : vector<8x36xf32>
    %cst_24 = arith.constant 0.333333343 : f32
    %36 = vector.broadcast %cst_24 : f32 to vector<8x36xf32>
    %37 = arith.mulf %35, %36 : vector<8x36xf32>
    %c0_25 = arith.constant 0 : index
    %c0_26 = arith.constant 0 : index
    %c0_27 = arith.constant 0 : index
    %38 = vector.load %arg3[%c0_25, %c0_26, %c0_27] : memref<1x36x256xbf16, #tpu.memory_space<vmem>>, vector<1x36x256xbf16>
    %39 = vector.shape_cast %38 : vector<1x36x256xbf16> to vector<36x256xbf16>
    %40 = arith.truncf %37 : vector<8x36xf32> to vector<8x36xbf16>
    %cst_28 = arith.constant dense<0.000000e+00> : vector<8x256xf32>
    %41 = tpu.matmul %40, %39, %cst_28 {dimension_numbers = #tpu.dot_dimension_numbers<[1], [0], [0], [1], [0, 0, 1, 1], [], []>} : vector<8x36xbf16>, vector<36x256xbf16>, vector<8x256xf32> -> vector<8x256xf32>
    %42 = vector.broadcast %21 : vector<8x1xf32> to vector<8x256xf32>
    %43 = arith.addf %41, %42 : vector<8x256xf32>
    %c0_29 = arith.constant 0 : index
    %c0_30 = arith.constant 0 : index
    %c0_31 = arith.constant 0 : index
    %44 = vector.load %arg11[%c0_29, %c0_30, %c0_31] : memref<1x8x256xf32, #tpu.memory_space<vmem>>, vector<1x8x256xf32>
    %45 = vector.shape_cast %44 : vector<1x8x256xf32> to vector<8x256xf32>
    %46 = vector.shape_cast %43 : vector<8x256xf32> to vector<1x8x256xf32>
    tpu.vector_store %arg11[%c0_29, %c0_30, %c0_31], %46 {strides = array<i32>} : memref<1x8x256xf32, #tpu.memory_space<vmem>>, vector<1x8x256xf32>,
    return
  }
  func.func @transform_0(%arg0: i32, %arg1: i32) -> (i32, i32, i32) {
    %c0_i32 = arith.constant 0 : i32
    %c0_i32_0 = arith.constant 0 : i32
    %c0_i32_1 = arith.constant 0 : i32
    return %arg0, %c0_i32, %c0_i32_0 : i32, i32, i32
  }
  func.func @transform_1(%arg0: i32, %arg1: i32) -> (i32, i32, i32) {
    %c0_i32 = arith.constant 0 : i32
    %c0_i32_0 = arith.constant 0 : i32
    return %arg0, %c0_i32, %arg1 : i32, i32, i32
  }
  func.func @transform_2(%arg0: i32, %arg1: i32) -> (i32, i32) {
    %c0_i32 = arith.constant 0 : i32
    %c0_i32_0 = arith.constant 0 : i32
    %c0_i32_1 = arith.constant 0 : i32
    return %c0_i32, %c0_i32_0 : i32, i32
  }
  func.func @transform_3(%arg0: i32, %arg1: i32) -> (i32, i32) {
    %c0_i32 = arith.constant 0 : i32
    %c0_i32_0 = arith.constant 0 : i32
    %c0_i32_1 = arith.constant 0 : i32
    return %c0_i32, %c0_i32_0 : i32, i32
  }
  func.func @transform_4(%arg0: i32, %arg1: i32) -> (i32, i32) {
    %c0_i32 = arith.constant 0 : i32
    %c0_i32_0 = arith.constant 0 : i32
    %c0_i32_1 = arith.constant 0 : i32
    return %c0_i32, %c0_i32_0 : i32, i32
  }
  func.func @transform_5(%arg0: i32, %arg1: i32) -> (i32, i32) {
    %c0_i32 = arith.constant 0 : i32
    %c0_i32_0 = arith.constant 0 : i32
    %c0_i32_1 = arith.constant 0 : i32
    return %c0_i32, %c0_i32_0 : i32, i32
  }
  func.func @transform_6(%arg0: i32, %arg1: i32) -> (i32, i32) {
    %c0_i32 = arith.constant 0 : i32
    %c0_i32_0 = arith.constant 0 : i32
    %c0_i32_1 = arith.constant 0 : i32
    return %c0_i32, %c0_i32_0 : i32, i32
  }
  func.func @transform_7(%arg0: i32, %arg1: i32) -> (i32, i32) {
    %c0_i32 = arith.constant 0 : i32
    %c0_i32_0 = arith.constant 0 : i32
    %c0_i32_1 = arith.constant 0 : i32
    return %c0_i32, %c0_i32_0 : i32, i32
  }
  func.func @transform_8(%arg0: i32, %arg1: i32) -> (i32, i32) {
    %c0_i32 = arith.constant 0 : i32
    %c0_i32_0 = arith.constant 0 : i32
    %c0_i32_1 = arith.constant 0 : i32
    return %c0_i32, %c0_i32_0 : i32, i32
  }
  func.func @transform_9(%arg0: i32, %arg1: i32) -> (i32, i32, i32) {
    %c0_i32 = arith.constant 0 : i32
    %c0_i32_0 = arith.constant 0 : i32
    return %arg0, %c0_i32, %arg1 : i32, i32, i32
  }
}

</mosaic_0001>

<bundles_post_ra>
// kernel: tpu_custom_call.1
= control target key start
LH: loop header
LB: loop body
LE: loop exit
PB: predicated region body
PF: predicated region fallthrough
CT: control target
= control target key end

     0   :  { %14 = vsyncpa [#allocation3], 0  ;;  %s2488_s0 = inlined_call_operand.vmem [shape: f32[2,1,36], index: 0, kind: input, shape index: {}]   ;;  %s2489_s1 = inlined_call_operand.vmem [shape: bf16[2,36,256], index: 1, kind: input, shape index: {}]   ;;  %s2490_s2 = inlined_call_operand.vmem [shape: f32[36,36], index: 2, kind: input, shape index: {}]   ;;  %s2491_s3 = inlined_call_operand.vmem [shape: f32[36,36], index: 3, kind: input, shape index: {}]   ;;  %s2492_s4 = inlined_call_operand.vmem [shape: f32[1,36], index: 4, kind: input, shape index: {}]   ;;  %s2493_s5 = inlined_call_operand.vmem [shape: f32[8,36], index: 5, kind: input, shape index: {}]   ;;  %s2494_s6 = inlined_call_operand.vmem [shape: f32[8,1], index: 6, kind: input, shape index: {}]   ;;  %s2495_s7 = inlined_call_operand.vmem [shape: f32[8,36], index: 7, kind: input, shape index: {}]   ;;  %s2496_s8 = inlined_call_operand.vmem [shape: f32[8,1], index: 8, kind: input, shape index: {}]   ;;  %s2497_s9 = inlined_call_operand.hbm [shape: f32[2,8,256], index: 9, kind: output, shape index: {}]  }
   0x1   :  { %16 = vsyncpa [#allocation3 + $0x1], 0  ;;  %s2178_s30 = smov 0   ;;  %s2180_s10 = smov 0  }
   0x2   :  { %s2182_s11 = smov 0   ;;  %s2184_s12 = smov 0  }
   0x3   :  { %s2186_s13 = smov 0   ;;  %s2188_s14 = smov 0  }
   0x4 LB: > { %s1627_s15 = sadd.s32 4294967295, %s2121_s14   ;;  %s1628_s16 = sadd.s32 4294967294, %s2121_s14   ;;  %s2121_s14 = sphi %s2188_s14, %s22_s14   ;;  %s2117_s13 = sphi %s2186_s13, %s2504_s13   ;;  %s2113_s12 = sphi %s2184_s12, %s2503_s12   ;;  %s2109_s11 = sphi %s2182_s11, %s2502_s11   ;;  %s2105_s10 = sphi %s2180_s10, %s2501_s10   ;;  %s2101_s30 = sphi %s2178_s30, %s2500_s30  }
   0x5   : > { %s34_s17 = sadd.s32 1, %s2117_s13  ;;  %s244_s18 = sadd.s32 1, %s2109_s11 }
   0x6   : > { %p36_p0 = scmp.ge.s32.totalorder %s34_s17, 2  ;;  %p254_p1 = scmp.ne.s32.totalorder %s2109_s11, %s2105_s10 }
   0x7   : > { %p255_p2 = scmp.eq.s32.totalorder %s1627_s15, 1  ;;  %p260_p3 = scmp.ne.s32.totalorder %s2105_s10, %s2101_s30 }
   0x8   : > { %s2506_s17 = smov (%p36_p0, %s34_s17), 0  ;;  %p261_p5 = scmp.eq.s32.totalorder %s1628_s16, 1 }
   0x9   : > { %p2218_p4 = por %p255_p2, %p254_p1  ;;  %s239_s20 = ssub.s32 %s2117_s13, %s2506_s17 }
   0xa   : > { %p1631_p6 = scmp.ge.s32.totalorder %s2121_s14, 1  ;;  %p242_p7 = scmp.eq.s32.totalorder %s239_s20, 0 }
   0xb   : > { %p2225_p8 = por %p261_p5, %p260_p3  ;;  %p319_p9 = scmp.lt.s32.totalorder %s2121_s14, 3 }
   0xc   : > { %s2231_s22 = scalar_select %p242_p7, %s2109_s11, %s244_s18  }
   0xd   : > { %p320_p10 = pnand %p1631_p6, %p319_p9 }
   0xe   : > { %v378_v0 = vld [vmem:[%s2490_s2] sm:$0xff] (!%p320_p10)  ;;  %v379_v1 = vld [vmem:[%s2490_s2 + $0x8] sm:$0xff] (!%p320_p10)  ;;  %v380_v2 = vld [vmem:[%s2490_s2 + $0x10] sm:$0xff] (!%p320_p10)  ;;  %vm387_vm0 = vcmask (!%p320_p10), 1043456   ;;  %v2123_v3 = vmov (!%p320_p10), 0.0|0.0   ;;  %p362_p11 = scmp.lt.s32.totalorder (!%p320_p10), %s2113_s12, 1 }
   0xf   : > { %323 = sbr.rel (%p320_p10) target bundleno = 834 (0x342), region = 56  ;;  %1883 = vmatprep.subr.bf16.mxu0 (!%p320_p10), %v2123_v3  ;;  %v392_v4 = vand.u32 (!%p320_p10), 4294901760, %v378_v0  ;;  %v395_v5 = vand.u32 (!%p320_p10), 4294901760, %v379_v1  ;;  %v381_v6 = vld [vmem:[%s2490_s2 + $0x18] sm:$0xff] (!%p320_p10)  ;;  %v398_v7 = vand.u32 (!%p320_p10), 4294901760, %v380_v2  ;;  %1877 = vmatprep.subr.bf16.mxu1 (!%p320_p10), %v2123_v3  ;;  %vm2124_vm1 = vmmov (!%p320_p10), 0  }
  0x10   : > { %v382_v8 = vld [vmem:[%s2490_s2 + $0x20] sm:$0xf] (!%p320_p10)  ;;  %v401_v9 = vand.u32 (!%p320_p10), 4294901760, %v381_v6  ;;  %v2125_v15 = vmov (!%p320_p10), 0.0   ;;  %vm383_vm2 = vcmask (!%p320_p10), 293888   ;;  %v890_v49 = vld [vmem:[%s2491_s3 + $0x8] sm:$0xff] (!%p320_p10) }
  0x11   : > { %v389_v10 = vsel (!%p320_p10), %vm387_vm0, %v382_v8, 0  ;;  %v2252_v11 = vsub.f32 (!%p320_p10), %v378_v0, %v392_v4  ;;  %v2254_v12 = vsub.f32 (!%p320_p10), %v379_v1, %v395_v5  ;;  %v2256_v13 = vsub.f32 (!%p320_p10), %v380_v2, %v398_v7  ;;  %1744 = vmatprep.mubr.msk.f32.mxu0 (!%p320_p10), %vm2124_vm1, %v2125_v15  ;;  %1731 = vmatprep.mubr.msk.f32.mxu1 (!%p320_p10), %vm2124_vm1, %v2125_v15  ;;  %v889_v48 = vld [vmem:[%s2491_s3] sm:$0xff] (!%p320_p10)  ;;  %v891_v53 = vld [vmem:[%s2491_s3 + $0x10] sm:$0xff] (!%p320_p10)  ;;  %v892_v54 = vld [vmem:[%s2491_s3 + $0x18] sm:$0xff] (!%p320_p10)  ;;  %s359_s29 = sand.u32 (!%p320_p10), 1, %s2105_s10   ;;  %s1648_s16 = sshll.u32 (!%p320_p10), %s2113_s12, 8 }
  0x12   : > { %v2258_v14 = vand.u32 (!%p320_p10), 4294901760, %v389_v10  ;;  %v2264_v16 = vsub.f32 (!%p320_p10), %v381_v6, %v401_v9  ;;  %v2269_v17 = vpack.c.bf16 (!%p320_p10), %v395_v5, %v392_v4  ;;  %v1881_v29 = vpack.c.bf16 (!%p320_p10), %v401_v9, %v398_v7  ;;  %v893_v0 = vld [vmem:[%s2491_s3 + $0x20] sm:$0xf] (!%p320_p10)  ;;  %s1632_s15 = sshll.u32 (!%p320_p10), %s359_s29, 4  ;;  %s2441_s26 = scalar_lea.hbm (!%p320_p10), %s2497_s9, %s1648_s16 }
  0x13   : > { %v474_v18 = vand.u32 (!%p320_p10), 4294901760, %v2252_v11  ;;  %v481_v19 = vand.u32 (!%p320_p10), 4294901760, %v2254_v12  ;;  %v488_v20 = vand.u32 (!%p320_p10), 4294901760, %v2256_v13  ;;  %v1890_v44 = vpack.c.bf16 (!%p320_p10), %v2254_v12, %v2252_v11  ;;  %s361_s18 = scalar_lea.vmem (!%p320_p10), [#allocation2], %s1632_s15 }
  0x14   : > { %v2275_v21 = vsub.f32 (!%p320_p10), %v389_v10, %v2258_v14  ;;  %v495_v22 = vand.u32 (!%p320_p10), 4294901760, %v2264_v16  ;;  %1879 = vmatpush3.bf16.msra.mxu1 (!%p320_p10), %v2269_v17  ;;  %v1893_v45 = vpack.c.bf16 (!%p320_p10), %v2264_v16, %v2256_v13  ;;  %v902_v50 = vand.u32 (!%p320_p10), 4294901760, %v889_v48  ;;  %s1542_s23 = sshll.u32 (!%p320_p10), %s361_s18, 4  ;;  %s2443_s23 = int_to_ptr.vmem [resolvable:$true] %s1542_s23 }
  0x15   : > { %v475_v23 = vsub.f32 (!%p320_p10), %v2252_v11, %v474_v18  ;;  %v482_v24 = vsub.f32 (!%p320_p10), %v2254_v12, %v481_v19  ;;  %v489_v25 = vsub.f32 (!%p320_p10), %v2256_v13, %v488_v20  ;;  %1880 = vmatprep.subr.bf16.mxu1 (!%p320_p10), %v2123_v3  ;;  %v1902_v46 = vpack.c.bf16 (!%p320_p10), %v481_v19, %v474_v18 }
  0x16   : > { %s2267_s20 = scalar_select %p362_p11, %s2113_s12, 1  ;;  %v496_v27 = vsub.f32 %v2264_v16, %v495_v22  ;;  %v502_v33 = vand.u32 4294901760, %v2275_v21  ;;  %v1905_v47 = vpack.c.bf16 %v495_v22, %v488_v20  ;;  %v905_v51 = vand.u32 4294901760, %v890_v49 }
  0x17   : > { %v476_v30 = vand.u32 4294901760, %v475_v23  ;;  %v483_v31 = vand.u32 4294901760, %v482_v24  ;;  %v490_v32 = vand.u32 4294901760, %v489_v25  ;;  %v2342_v55 = vsub.f32 %v889_v48, %v902_v50  ;;  %v1408_v48 = vld [vmem:[%s2494_s6] sm:$0xff]  ;;  %s1526_s12 = scalar_lea.sflag [#allocation3], %s359_s29 }
  0x18   : > { %s364_s25 = scalar_lea.vmem %s2488_s0, %s2267_s20  ;;  %v497_v34 = vand.u32 4294901760, %v496_v27  ;;  %1882 = vmatpush3.bf16.msra.mxu1 %v1881_v29  ;;  %v503_v39 = vsub.f32 %v2275_v21, %v502_v33  ;;  %v2333_v52 = vpack.c.bf16 %v905_v51, %v902_v50  ;;  %v2344_v56 = vsub.f32 %v890_v49, %v905_v51  ;;  %s1969_s24 = smul.u32 40, %s2267_s20 }
  0x19   : > { %v377_v26 = vld [vmem:[%s364_s25] sm:$0x1]  ;;  %v1884_v36 = vpack.c.bf16 %v483_v31, %v476_v30  ;;  %1729 = vmatprep.subr.mxu1 %v2125_v15  ;;  %v908_v57 = vand.u32 4294901760, %v891_v53  ;;  %v911_v58 = vand.u32 4294901760, %v892_v54  ;;  %v984_v60 = vand.u32 4294901760, %v2342_v55  ;;  %s2127_s20 = smov [#allocation2]  }
  0x1a   : > { %v385_v28 = vsel %vm383_vm2, %v377_v26, 0  ;;  %v1887_v38 = vpack.c.bf16 %v497_v34, %v490_v32  ;;  %v504_v42 = vand.u32 4294901760, %v503_v39  ;;  %v991_v61 = vand.u32 4294901760, %v2344_v56  ;;  %v1399_v30 = vld [vmem:[%s2493_s5] sm:$0xff]  ;;  %s373_s27 = scalar_lea.vmem %s2489_s1, %s1969_s24  ;;  %s2047_s28 = sshll.u32 %s2127_s20, 4  ;;  %s2048_s28 = int_to_ptr.vmem [resolvable:$false] %s2047_s28 }
  0x1b   : > { %v461_v35 = vand.u32 4294901760, %v385_v28  ;;  %1885 = vmatpush3.bf16.msra.mxu0 %v1884_v36  ;;  %v2347_v59 = vpack.c.bf16 %v911_v58, %v908_v57  ;;  %v2352_v62 = vsub.f32 %v891_v53, %v908_v57  ;;  %v2354_v63 = vsub.f32 %v892_v54, %v911_v58  ;;  %v2036_v53 = vld [vmem:[%s373_s27 + $0x14] ss:$8 sps:$4 sm:$0xff]   ;;  %v2034_v54 = vld [vmem:[%s373_s27 + $0x10] ss:$8 sps:$4 sm:$0xff]   ;;  %s2049_s15 = scalar_lea.vmem %s2048_s28, 512  ;;  %p2050_p1 = scmp.lt.s32.totalorder %s2443_s23, %s2048_s28 }
  0x1c   : > { %1886 = vmatprep.subr.bf16.mxu0 %v2123_v3  ;;  %1730 = vmatpush3.msra.mxu1 %v2258_v14  ;;  %v985_v1 = vsub.f32 %v2342_v55, %v984_v60  ;;  %v992_v2 = vsub.f32 %v2344_v56, %v991_v61  ;;  %v899_v4 = vsel %vm387_vm0, %v893_v0, 0  ;;  %v1938_v19 = vpack.c.bf16 %v991_v61, %v984_v60 }
  0x1d   : > { %v462_v37 = vsub.f32 %v385_v28, %v461_v35  ;;  %1913 = vmatprep.subr.bf16.mxu1 %v2123_v3  ;;  %v2363_v5 = vand.u32 4294901760, %v899_v4  ;;  %v998_v8 = vand.u32 4294901760, %v2352_v62  ;;  %v1005_v9 = vand.u32 4294901760, %v2354_v63 }
  0x1e   : > { %v986_v6 = vand.u32 4294901760, %v985_v1  ;;  %v993_v7 = vand.u32 4294901760, %v992_v2  ;;  %v1929_v18 = vpack.c.bf16 %v2354_v63, %v2352_v62  ;;  %v1400_v23 = vlaneseq }
  0x1f   : > { %v463_v40 = vand.u32 4294901760, %v462_v37  ;;  %1888 = vmatpush3.bf16.msra.mxu0 %v1887_v38  ;;  %v999_v11 = vsub.f32 %v2352_v62, %v998_v8  ;;  %v1006_v12 = vsub.f32 %v2354_v63, %v1005_v9  ;;  %v1941_v20 = vpack.c.bf16 %v1005_v9, %v998_v8 }
  0x20   : > { %1742 = vmatprep.subr.mxu0 %v2125_v15  ;;  %v1920_v10 = vpack.c.bf16 %v993_v7, %v986_v6  ;;  %v2375_v24 = vshrl.u32 %v1400_v23, 7  ;;  %v1011_v39 = vsub.f32 %v899_v4, %v2363_v5  ;;  %vm1475_vm3 = vcmask 1041408  }
  0x21   : > { %v464_v41 = vsub.f32 %v462_v37, %v463_v40  ;;  %v1000_v13 = vand.u32 4294901760, %v999_v11 }
  0x22   : > { %v1402_v25 = vsub.s32 0, %v2375_v24 }
  0x23   : > { %v465_v43 = vand.u32 4294901760, %v464_v41  ;;  %1743 = vmatpush3.msra.mxu0 %v504_v42  ;;  %v1012_v42 = vand.u32 4294901760, %v1011_v39 }
  0x24   : > { %1889 = vmatprep.subr.bf16.mxu0 %v2123_v3  ;;  %1745 = vmatmul.mubr.f32.vlgmr.msra.gmra.mrb[0].mxu0 %v461_v35 }
  0x25   : > { %1732 = vmatmul.mubr.f32.vlgmr.msra.gmra.mrb[0].mxu1 %v465_v43  ;;  %1891 = vmatpush3.bf16.msra.mxu0 %v1890_v44  ;;  %v1013_v44 = vsub.f32 %v1011_v39, %v1012_v42 }
  0x26   : > { %1809 = vmatprep.mubr.msk.f32.mxu1 %vm2124_vm1, %v2125_v15  ;;  %1757 = vmatprep.mubr.msk.f32.mxu0 %vm2124_vm1, %v2125_v15 }
  0x27   : > { %1892 = vmatprep.subr.bf16.mxu0 %v2123_v3  ;;  %1915 = vmatpush3.bf16.msra.mxu1 %v2333_v52 }
  0x28   : > { %1916 = vmatprep.subr.bf16.mxu1 %v2123_v3 }
  0x29   : > { %1894 = vmatpush3.bf16.msra.mxu0 %v1893_v45  ;;  %v1014_v45 = vand.u32 4294901760, %v1013_v44 }
  0x2a   : > { %1755 = vmatprep.subr.mxu0 %v2125_v15 }
  0x2b   : > { %1918 = vmatpush3.bf16.msra.mxu1 %v2347_v59 }
  0x2c   : > { %1807 = vmatprep.subr.mxu1 %v2125_v15 }
  0x2d   : > { %1756 = vmatpush3.msra.mxu0 %v2275_v21 }
  0x2e   : > { %1895 = vmatprep.subr.bf16.mxu0 %v2123_v3  ;;  %1758 = vmatmul.mubr.f32.vlgmr.msra.gmra.mrb[0].mxu0 %v462_v37 }
  0x2f   : > { %1897 = vmatpush3.bf16.msra.mxu0 %v2269_v17  ;;  %1770 = vmatprep.mubr.msk.f32.mxu0 %vm2124_vm1, %v2125_v15 }
  0x30   : > { %1898 = vmatprep.subr.bf16.mxu0 %v2123_v3  ;;  %1808 = vmatpush3.msra.mxu1 %v2363_v5 }
  0x31   : > { %1919 = vmatprep.subr.bf16.mxu1 %v2123_v3 }
  0x33   : > { %1900 = vmatpush3.bf16.msra.mxu0 %v1881_v29 }
  0x34   : > { %1768 = vmatprep.subr.mxu0 %v2125_v15 }
  0x37   : > { %1769 = vmatpush3.msra.mxu0 %v2258_v14 }
  0x38   : > { %1901 = vmatprep.subr.bf16.mxu0 %v2123_v3  ;;  %1771 = vmatmul.mubr.f32.vlgmr.msra.gmra.mrb[0].mxu0 %v463_v40 }
  0x39   : > { %1903 = vmatpush3.bf16.msra.mxu0 %v1902_v46  ;;  %1783 = vmatprep.mubr.msk.f32.mxu0 %vm2124_vm1, %v2125_v15  ;;  %v2126_v46 = vmov 0  }
  0x3a   : > { %1904 = vmatprep.subr.bf16.mxu0 %v2123_v3  ;;  %2030 = vset.pattern.permute.xlu1 %v2126_v46 }
  0x3b   : > { %2029 = vset.pattern.permute.xlu0 %v2126_v46 }
  0x3d   : > { %1906 = vmatpush3.bf16.msra.mxu0 %v1905_v47  ;;  %v1415_v47 = vld [vmem:[%s2496_s8] sm:$0xff] }
  0x3e   : > { %1781 = vmatprep.subr.mxu0 %v2125_v15 }
  0x41   : > { %1782 = vmatpush3.msra.mxu0 %v502_v33 }
  0x42   : > { %1907 = vmatprep.subr.bf16.mxu0 %v2123_v3  ;;  %1784 = vmatmul.mubr.f32.vlgmr.msra.gmra.mrb[0].mxu0 %v461_v35 }
  0x43   : > { %1909 = vmatpush3.bf16.msra.mxu0 %v2269_v17  ;;  %1796 = vmatprep.mubr.msk.f32.mxu0 %vm2124_vm1, %v2125_v15  ;;  %v1926_v17 = vpack.c.bf16 %v2344_v56, %v2342_v55  ;;  %v1440_v55 = vld [vmem:[%s373_s27 + $0x20] sm:$0x33] }
  0x44   : > { %1910 = vmatprep.subr.bf16.mxu0 %v2123_v3  ;;  %v1640_v56 = vcombine.high %v1440_v55, %v1440_v55  ;;  %v1639_v57 = vcombine.low %v1440_v55, %v1440_v55 }
  0x46   : > { %v1477_v58 = vsel %vm1475_vm3, %v1639_v57, 0 }
  0x47   : > { %1912 = vmatpush3.bf16.msra.mxu0 %v1881_v29  ;;  %v1410_v29 = vld [vmem:[%s2495_s7] sm:$0xff] }
  0x48   : > { %1794 = vmatprep.subr.mxu0 %v2125_v15 }
  0x4b   : > { %1795 = vmatpush3.msra.mxu0 %v2258_v14  ;;  %v1007_v14 = vand.u32 4294901760, %v1006_v12 }
  0x4c   : > { %1797 = vmatmul.mubr.f32.vlgmr.msra.gmra.mrb[0].mxu0 %v461_v35 }
  0x4d   : > { %v1923_v16 = vpack.c.bf16 %v1007_v14, %v1000_v13  ;;  %1514 = vmatprep.mubr.bf16.mxu0 %v2126_v46 }
  0xf8   : > { %v467_v21 = vpop.f32.mrb[0].mxu1 }
  0xf9   : > { %v1733_v22 = vpop.f32.mrb[1].mxu1 }
 0x11f   : > { %v885_v26 = vpop.f32.mrb[0].mxu0 }
 0x120   : > { %v1949_v27 = vadd.f32 %v885_v26, %v467_v21  ;;  %v1798_v28 = vpop.f32.mrb[1].mxu0 }
 0x122   : > { %v896_v31 = vsel %vm383_vm2, %v1949_v27, 0  ;;  %v1403_v32 = vrot.slane %v1949_v27, %v1402_v25 }
 0x123   : > { %v971_v33 = vand.u32 4294901760, %v896_v31 }
 0x124   : > { %v1411_v34 = vmul.f32 %v1410_v29, %v1403_v32  ;;  %v1404_v35 = vmul.f32 %v1403_v32, %v1399_v30 }
 0x125   : > { %v972_v36 = vsub.f32 %v896_v31, %v971_v33 }
 0x126   : > { %v1412_v37 = vsel %vm383_vm2, %v1411_v34, 0.0  ;;  %v1405_v38 = vsel %vm383_vm2, %v1404_v35, 0.0 }
 0x127   : > { %v973_v40 = vand.u32 4294901760, %v972_v36  ;;  %1413 = vadd.xlane.f32.xlu1 %v1412_v37  ;;  %1406 = vadd.xlane.f32.xlu0 %v1405_v38 }
 0x129   : > { %v974_v41 = vsub.f32 %v972_v36, %v973_v40 }
 0x12b   : > { %v975_v43 = vand.u32 4294901760, %v974_v41 }
 0x12d   : > { %1810 = vmatmul.mubr.f32.vlgmr.msra.gmra.mrb[2].mxu1 %v975_v43 }
 0x12e   : > { %1921 = vmatpush3.bf16.msra.mxu1 %v1920_v10  ;;  %1822 = vmatprep.mubr.msk.f32.mxu1 %vm2124_vm1, %v2125_v15 }
 0x12f   : > { %1922 = vmatprep.subr.bf16.mxu1 %v2123_v3 }
 0x132   : > { %1924 = vmatpush3.bf16.msra.mxu1 %v1923_v16 }
 0x133   : > { %1820 = vmatprep.subr.mxu1 %v2125_v15 }
 0x136   : > { %1821 = vmatpush3.msra.mxu1 %v1014_v45 }
 0x137   : > { %1823 = vmatmul.mubr.f32.vlgmr.msra.gmra.mrb[2].mxu1 %v971_v33  ;;  %1925 = vmatprep.subr.bf16.mxu1 %v2123_v3 }
 0x138   : > { %1927 = vmatpush3.bf16.msra.mxu1 %v1926_v17  ;;  %1835 = vmatprep.mubr.msk.f32.mxu1 %vm2124_vm1, %v2125_v15 }
 0x139   : > { %1928 = vmatprep.subr.bf16.mxu1 %v2123_v3 }
 0x13c   : > { %1930 = vmatpush3.bf16.msra.mxu1 %v1929_v18 }
 0x13d   : > { %1833 = vmatprep.subr.mxu1 %v2125_v15 }
 0x140   : > { %1834 = vmatpush3.msra.mxu1 %v1011_v39 }
 0x141   : > { %1836 = vmatmul.mubr.f32.vlgmr.msra.gmra.mrb[2].mxu1 %v972_v36  ;;  %1931 = vmatprep.subr.bf16.mxu1 %v2123_v3 }
 0x142   : > { %1933 = vmatpush3.bf16.msra.mxu1 %v2333_v52  ;;  %1848 = vmatprep.mubr.msk.f32.mxu1 %vm2124_vm1, %v2125_v15 }
 0x143   : > { %1934 = vmatprep.subr.bf16.mxu1 %v2123_v3 }
 0x146   : > { %1936 = vmatpush3.bf16.msra.mxu1 %v2347_v59 }
 0x147   : > { %1846 = vmatprep.subr.mxu1 %v2125_v15 }
 0x14a   : > { %1847 = vmatpush3.msra.mxu1 %v2363_v5 }
 0x14b   : > { %1849 = vmatmul.mubr.f32.vlgmr.msra.gmra.mrb[2].mxu1 %v973_v40  ;;  %1937 = vmatprep.subr.bf16.mxu1 %v2123_v3 }
 0x14c   : > { %1939 = vmatpush3.bf16.msra.mxu1 %v1938_v19  ;;  %1861 = vmatprep.mubr.msk.f32.mxu1 %vm2124_vm1, %v2125_v15 }
 0x14d   : > { %1940 = vmatprep.subr.bf16.mxu1 %v2123_v3 }
 0x150   : > { %1942 = vmatpush3.bf16.msra.mxu1 %v1941_v20 }
 0x151   : > { %1859 = vmatprep.subr.mxu1 %v2125_v15 }
 0x154   : > { %1860 = vmatpush3.msra.mxu1 %v1012_v42 }
 0x155   : > { %1862 = vmatmul.mubr.f32.vlgmr.msra.gmra.mrb[2].mxu1 %v971_v33  ;;  %1943 = vmatprep.subr.bf16.mxu1 %v2123_v3 }
 0x156   : > { %1945 = vmatpush3.bf16.msra.mxu1 %v2333_v52  ;;  %1874 = vmatprep.mubr.msk.f32.mxu1 %vm2124_vm1, %v2125_v15 }
 0x157   : > { %1946 = vmatprep.subr.bf16.mxu1 %v2123_v3  ;;  %v2033_v3 = vld [vmem:[%s373_s27 + $0x4] ss:$8 sps:$4 sm:$0xff]  }
 0x158   : > { %1482 = vmatprep.subr.bf16.mxu0 %v2033_v3 }
 0x15a   : > { %1948 = vmatpush3.bf16.msra.mxu1 %v2347_v59  ;;  %v894_v59 = vld [vmem:[%s2492_s4] sm:$0x1] }
 0x15b   : > { %1872 = vmatprep.subr.mxu1 %v2125_v15  ;;  %v2031_v15 = vld [vmem:[%s373_s27] ss:$8 sps:$4 sm:$0xff]   ;;  %s2043_s27 = scalar_lea.vmem %s2443_s23, 256 }
 0x15c   : > { %1483 = vmatpush1.bf16.msra.mxu0 %v2031_v15  ;;  %p2044_p12 = scmp.ne.s32.totalorder %s2443_s23, %s2043_s27  ;;  %p2051_p2 = scmp.lt.s32.totalorder %s2049_s15, %s2043_s27 }
 0x15d   : > { %1484 = vmatprep.subr.bf16.mxu0 %v2036_v53 }
 0x15e   : > { %1873 = vmatpush3.msra.mxu1 %v2363_v5  ;;  %p2045_p13 = pnand %p2044_p12, %p2218_p4  ;;  %p2052_p3 = por %p2051_p2, %p2050_p1 }
 0x15f   : > { %1875 = vmatmul.mubr.f32.vlgmr.msra.gmra.mrb[2].mxu1 %v971_v33 }
 0x160   : > { %1485 = vmatpush1.bf16.msra.mxu0 %v2034_v54  ;;  %p2046_p0 = pneg %p2045_p13 }
 0x161   : > { %1641 = vmatprep.subr.msk.bf16.mxu0 %vm1475_vm3, %v1640_v56 }
 0x162   : > { %p2053_p5 = pnand %p2052_p3, %p2046_p0 }
 0x164   : > { %1487 = vmatpush1.bf16.msra.mxu0 %v1477_v58 }
 0x1b4   : > { %v1414_v49 = vpop.xlane.xlu1 %1413  ;;  %v1407_v50 = vpop.xlane.xlu0 %1406 }
 0x1b5   : > { %v1416_v51 = vadd.f32 %v1415_v47, %v1414_v49  ;;  %v1409_v52 = vadd.f32 %v1408_v48, %v1407_v50 }
 0x1b7   : > { %1444 = vperm.xlu1 %2030, %v1416_v51   ;;  %1423 = vperm.xlu0 %2029, %v1409_v52  }
 0x232   : > { %v1395_v60 = vpop.f32.mrb[2].mxu1 }
 0x233   : > { %v1950_v61 = vadd.f32 %v1395_v60, %v894_v59  ;;  %v1876_v62 = vpop.f32.mrb[3].mxu1 }
 0x235   : > { %v1420_v63 = vrot.slane %v1950_v61, %v1402_v25 }
 0x236   : > { %v1424_v0 = vpop.permute.xlu0 %1423  ;;  %v1445_v12 = vpop.permute.xlu1 %1444 }
 0x237   : > { %v1426_v1 = vmul.f32 %v1424_v0, %v1420_v63 }
 0x239   : > { %v1427_v2 = vsub.f32 0.0, %v1426_v1 }
 0x23b   : > { %v1428_v4 = vmul.f32 1.442695, %v1427_v2 }
 0x23d   : > { %2039 = vpow2.f32 %v1428_v4 }
 0x247   : > { %v2040_v5 = vpop.eup %2039 }
 0x248   : > { %v1430_v6 = vadd.f32 1.0, %v2040_v5 }
 0x24a   : > { %2041 = vrcp.f32 %v1430_v6 }
 0x254   : > { %v2042_v7 = vpop.eup %2041 }
 0x255   : > { %v1433_v8 = vmul.f32 2.0, %v2042_v7 }
 0x257   : > { %v1634_v9 = vadd.f32 -1.0, %v1433_v8 }
 0x259   : > { %v1435_v10 = vmul.f32 0.33333334, %v1634_v9 }
 0x25b   : > { %v1441_v11 = vpack.c.bf16 %v1435_v10, %v1435_v10 }
 0x25d   : > { %1642 = vmatmul.mubr.msk.bf16.vlgmr.msra.gmra.mrb[4].mxu0 %vm383_vm2, %v1441_v11 }
 0x330   : > { %v1516_v13 = vpop.f32.mrb[4].mxu0 }
 0x331   : > { %v1517_v14 = vadd.f32 %v1516_v13, %v1445_v12  ;;  %v1518_v16 = vpop.f32.mrb[5].mxu0 }
 0x332   : > { %v1519_v17 = vadd.f32 %v1518_v16, %v1445_v12  ;;  %v1520_v18 = vpop.f32.mrb[6].mxu0 }
 0x333   : > { %1523 = vst [vmem:[%s361_s18] sm:$0xff] %v1517_v14  ;;  %v1521_v19 = vpop.f32.mrb[7].mxu0 }
 0x334   : > { %1524 = vst [vmem:[%s361_s18 + $0x8] sm:$0xff] %v1519_v17 }
 0x335   : > { %2056 = shalt.err (!%p2053_p5)
}
 0x336   : > { %s2057_s29 = scalar_lea.hbm %s2441_s26, 256  ;;  %s2061_s24 = scalar_lea.hbm %s2497_s9, 512 }
 0x337   : > { %p2058_p6 = scmp.ne.s32.totalorder %s2441_s26, %s2057_s29  ;;  %p2062_p10 = scmp.lt.u32.totalorder %s2441_s26, %s2497_s9 }
 0x338   : > { %p2063_p11 = scmp.lt.u32.totalorder %s2061_s24, %s2057_s29  ;;  %p2065_p13 = scmp.lt.u32.totalorder %s2057_s29, %s2441_s26 }
 0x339   : > { %p2059_p7 = pnand %p2058_p6, %p2218_p4 }
 0x33a   : > { %p2064_p12 = por %p2063_p11, %p2062_p10 }
 0x33b   : > { %p2060_p9 = pneg %p2059_p7 }
 0x33c   : > { %p2066_p0 = por %p2065_p13, %p2064_p12 }
 0x33e   : > { %p2067_p1 = pnand %p2066_p0, %p2060_p9 }
 0x340   : > { %2070 = shalt.err (!%p2067_p1)
}
 0x341   : > { %1970 = dma.vmem_to_hbm [thread:$0]  (%p2218_p4), %s2443_s23, 256, %s2441_s26, %s1526_s12  }
 0x342 PF: > { %p1976_p2 = scmp.ge.s32.totalorder %s2121_s14, 2  ;;  %s1554_s27 = sand.u32 1, %s2101_s30  }
 0x343   : > { %s1555_s28 = scalar_lea.sflag [#allocation3], %s1554_s27 }
 0x344   : > { %p1973_p3 = pnand %p1976_p2, %p2225_p8 }
 0x346   : > { %2096 = dma.done.wait (!%p1973_p3), %s1555_s28, 256  }
 0x347   : > { %2098 = vsyncadd (!%p1973_p3), %s1555_s28, 4294967040  ;;  %s22_s14 = sadd.s32 1, %s2121_s14   ;;  %s2500_s30 = smov %s2105_s10 }
 0x348   : > { %p19_p5 = scmp.ge.s32.totalorder %s22_s14, 4   ;;  %s2501_s10 = smov %s2109_s11 }
 0x349   : > { %s2502_s11 = smov %s2231_s22  ;;  %s2503_s12 = smov %s2117_s13 }
 0x34a   : > { %s2504_s13 = smov %s2506_s17  ;;  %21 = sbr.rel (!%p19_p5) target bundleno = 4 (0x4), region = 94 }
 0x351   :  { %1560 = vsyncpa [#allocation3], 1 }
 0x352   :  { %1562 = vsyncpa [#allocation3 + $0x1], 1 }

</bundles_post_ra>
